<compile_context>
chip_gen: v6e
topology: v6e:2x2x1
jax: 0.10.0
libtpu: 0.0.40
codegen_flags: <defaults>
</compile_context>

<pallas_src>
import math
import numpy as np
import jax
import jax.numpy as jnp
from jax.experimental import pallas as pl
from jax.experimental.pallas import tpu as pltpu


def _nearest_src(out_size, in_size):
    """PyTorch nearest rule: src = min((dst * in) // out, in - 1)."""
    return np.minimum((np.arange(out_size) * in_size) // out_size, in_size - 1)


def _round_up(a, b):
    return ((a + b - 1) // b) * b


def _device_caps():
    """(max output-block bytes, scoped-VMEM limit bytes) per TPU generation."""
    kind = ""
    try:
        kind = jax.devices()[0].device_kind.lower()
    except Exception:
        pass
    if "v6" in kind:   # v6e: 128 MiB physical VMEM, fast HBM -> large tiles pay off
        return 12 << 20, 96 << 20
    if "v7" in kind:   # v7x: only 64 MiB VMEM/TC -> moderate tiles, explicit limit
        return 6 << 20, 48 << 20
    if "v5e" in kind or "v5 lite" in kind or "v5lite" in kind:
        return 4 << 20, 56 << 20          # v5e: 16 MiB default scoped, 128 MiB physical
    return 4 << 20, 32 << 20              # v4 / v5p / unknown: conservative


def _choose_block_rows(N, H_in, H_out, in_row_bytes, out_row_bytes, resident_bytes,
                       out_cap, vmem_budget, extra_ok=None):
    """Pick k | gcd(H_in, H_out): blocks of TH = k*H_out/g output rows use exactly the
    TH_in = k*H_in/g aligned input rows, so BlockSpec index maps stay trivial."""
    g = math.gcd(H_in, H_out)
    h_in_unit, h_out_unit = H_in // g, H_out // g
    divisors = [d for d in range(g, 0, -1) if g % d == 0]

    def sizes(k):
        th, th_in = k * h_out_unit, k * h_in_unit
        out_b = th * out_row_bytes
        in_b = th_in * in_row_bytes
        total = 2 * (out_b + in_b) + resident_bytes   # double-buffered blocks + resident sel
        return th, th_in, out_b, total

    def ok(k, need_steps):
        th, th_in, out_b, total = sizes(k)
        if extra_ok is not None and not extra_ok(th, th_in):
            return False
        if out_b > out_cap or total > vmem_budget:
            return False
        if need_steps and (N * (g // k) < 8 or out_b < (64 << 10)):
            return False
        return True

    for k in divisors:     # pass 1: enough grid steps for pipelining / both v7x TCs
        if ok(k, True):
            return k
    for k in divisors:     # pass 2: just respect the per-generation VMEM caps
        if ok(k, False):
            return k
    # pass 3: minimal unified block, ignoring the (perf-only) out_cap / step count
    th, th_in, _, total = sizes(1)
    if (extra_ok is None or extra_ok(th, th_in)) and total <= vmem_budget:
        return 1
    return None            # caller falls back to the per-output-row kernel


def upsample_nearest2d_nhwc(x, output_size, *, force_per_row=False):
    """Nearest 2D upsample (or general resize), NHWC layout, via Pallas TPU kernels."""
    N, H_in, W_in, C = x.shape
    H_out, W_out = int(output_size[0]), int(output_size[1])
    out_dtype = x.dtype

    if not jnp.issubdtype(x.dtype, jnp.floating):
        # TODO(synk): integer dtypes can't go through the one-hot MXU matmul exactly past
        # 2^24; the CUDA op this mirrors only handles float/half, so use a jnp gather.
        h_src = jnp.asarray(_nearest_src(H_out, H_in))
        w_src = jnp.asarray(_nearest_src(W_out, W_in))
        return x[:, h_src][:, :, w_src]

    # Keep bf16 on the MXU; anything else (f32, f16) selects through f32 — exact either way.
    compute_dtype = jnp.bfloat16 if x.dtype == jnp.bfloat16 else jnp.float32
    c_item = jnp.dtype(compute_dtype).itemsize
    itemsize = jnp.dtype(x.dtype).itemsize

    out_cap, vmem_limit = _device_caps()
    vmem_budget = (vmem_limit * 3) // 5

    in_bytes = N * H_in * W_in * C * itemsize
    out_bytes = N * H_out * W_out * C * itemsize
    g = math.gcd(H_in, H_out)

    # ------------------ lane-folded path: fold W and C into one lane axis ------------------
    K_in, K_out = W_in * C, W_out * C
    selT_bytes = _round_up(K_in, 8) * _round_up(K_out, 128) * c_item
    if (not force_per_row) and C < 128 and selT_bytes <= (2 << 20):
        def folded_ok(th, th_in):
            # 3-D blocks (1, TH, K): second-minor block dim must be 8-aligned or full.
            return (th % 8 == 0 or th == H_out) and (th_in % 8 == 0 or th_in == H_in)

        k = _choose_block_rows(
            N, H_in, H_out,
            in_row_bytes=_round_up(K_in, 128) * itemsize,
            out_row_bytes=_round_up(K_out, 128) * itemsize,
            resident_bytes=selT_bytes,
            out_cap=out_cap, vmem_budget=vmem_budget, extra_ok=folded_ok)
        if k is not None:
            th, th_in = k * (H_out // g), k * (H_in // g)
            # Local H-nearest mapping (identical for every block — see header).
            src_local = (np.arange(th) * H_in) // H_out
            hsel = np.zeros((th, th_in), np.float32)
            hsel[np.arange(th), src_local] = 1.0
            # Folded W(+C) selection one-hot: (w_in, c) -> (w_out, c).
            src_w = _nearest_src(W_out, W_in)
            selT = np.zeros((K_in, K_out), np.float32)
            cols = np.arange(K_out)
            selT[src_w[cols // C] * C + (cols % C), cols] = 1.0

            def kernel(selT_ref, hsel_ref, x_ref, o_ref):
                x_blk = x_ref[0].astype(compute_dtype)                 # (th_in, W_in*C)
                y = jnp.dot(x_blk, selT_ref[...],
                            preferred_element_type=jnp.float32)        # (th_in, W_out*C)
                out = jnp.dot(hsel_ref[...], y.astype(compute_dtype),
                              preferred_element_type=jnp.float32)      # (th,   W_out*C)
                o_ref[0] = out.astype(o_ref.dtype)                     # one dense store

            y = pl.pallas_call(
                kernel,
                out_shape=jax.ShapeDtypeStruct((N, H_out, K_out), out_dtype),
                grid=(N, g // k),
                in_specs=[
                    pl.BlockSpec((K_in, K_out), lambda n, hb: (0, 0)),     # resident
                    pl.BlockSpec((th, th_in), lambda n, hb: (0, 0)),       # resident
                    pl.BlockSpec((1, th_in, K_in), lambda n, hb: (n, hb, 0)),
                ],
                out_specs=pl.BlockSpec((1, th, K_out), lambda n, hb: (n, hb, 0)),
                compiler_params=pltpu.CompilerParams(
                    dimension_semantics=("parallel", "parallel"),
                    vmem_limit_bytes=vmem_limit),
                cost_estimate=pl.CostEstimate(
                    flops=int(2 * N * H_in * K_in * K_out
                              + 2 * N * H_out * th_in * K_out),
                    transcendentals=0,
                    bytes_accessed=int(in_bytes + out_bytes + selT_bytes)),
            )(jnp.asarray(selT, compute_dtype), jnp.asarray(hsel, compute_dtype),
              x.reshape(N, H_in, K_in))
            return y.reshape(N, H_out, W_out, C)

    # ------------------ lane-dense path: lane axis = C (C >= 128 typical) ------------------
    if not force_per_row:
        k = _choose_block_rows(
            N, H_in, H_out,
            in_row_bytes=_round_up(W_in, 8) * _round_up(C, 128) * itemsize,
            out_row_bytes=_round_up(W_out, 8) * _round_up(C, 128) * itemsize,
            resident_bytes=_round_up(W_out, 8) * _round_up(W_in, 128) * c_item,
            out_cap=out_cap, vmem_budget=vmem_budget)
        if k is not None:
            th, th_in = k * (H_out // g), k * (H_in // g)
            src_local = (np.arange(th) * H_in) // H_out
            # Contiguous [j0, j1) range of local output rows fed by local input row t.
            row_ranges = [(int(np.searchsorted(src_local, t, "left")),
                           int(np.searchsorted(src_local, t, "right")))
                          for t in range(th_in)]
            sel = np.zeros((W_out, W_in), np.float32)
            sel[np.arange(W_out), _nearest_src(W_out, W_in)] = 1.0

            def kernel(sel_ref, x_ref, o_ref):
                sel_m = sel_ref[...]
                # One (W_out, C) tile live at a time; each input row is matmul'd once and
                # stored row-by-row to its replicated output rows (no broadcast_to blow-up).
                for t in range(th_in):
                    j0, j1 = row_ranges[t]
                    if j1 <= j0:
                        continue
                    row = x_ref[0, t].astype(compute_dtype)                  # (W_in, C)
                    out_row = jnp.dot(sel_m, row,
                                      preferred_element_type=jnp.float32
                                      ).astype(o_ref.dtype)                  # (W_out, C)
                    for j in range(j0, j1):
                        o_ref[0, j] = out_row

            return pl.pallas_call(
                kernel,
                out_shape=jax.ShapeDtypeStruct((N, H_out, W_out, C), out_dtype),
                grid=(N, g // k),
                in_specs=[
                    pl.BlockSpec((W_out, W_in), lambda n, hb: (0, 0)),       # resident
                    pl.BlockSpec((1, th_in, W_in, C), lambda n, hb: (n, hb, 0, 0)),
                ],
                out_specs=pl.BlockSpec((1, th, W_out, C), lambda n, hb: (n, hb, 0, 0)),
                compiler_params=pltpu.CompilerParams(
                    dimension_semantics=("parallel", "parallel"),
                    vmem_limit_bytes=vmem_limit),
                cost_estimate=pl.CostEstimate(
                    flops=int(2 * N * H_in * W_out * W_in * C),
                    transcendentals=0,
                    bytes_accessed=int(in_bytes + out_bytes)),
            )(jnp.asarray(sel, compute_dtype), x)

    # ---------- fallback: one output row per grid step (huge coprime H_in/H_out) ----------
    sel = np.zeros((W_out, W_in), np.float32)
    sel[np.arange(W_out), _nearest_src(W_out, W_in)] = 1.0

    def kernel(sel_ref, x_ref, o_ref):
        row = x_ref[0, 0].astype(compute_dtype)
        o_ref[0, 0] = jnp.dot(sel_ref[...], row,
                              preferred_element_type=jnp.float32).astype(o_ref.dtype)

    def x_index_map(n, oh):
        return (n, jnp.minimum((oh * H_in) // H_out, H_in - 1), 0, 0)

    reread = (H_out + H_in - 1) // H_in
    return pl.pallas_call(
        kernel,
        out_shape=jax.ShapeDtypeStruct((N, H_out, W_out, C), out_dtype),
        grid=(N, H_out),
        in_specs=[
            pl.BlockSpec((W_out, W_in), lambda n, oh: (0, 0)),
            pl.BlockSpec((1, 1, W_in, C), x_index_map),
        ],
        out_specs=pl.BlockSpec((1, 1, W_out, C), lambda n, oh: (n, oh, 0, 0)),
        compiler_params=pltpu.CompilerParams(
            dimension_semantics=("parallel", "parallel"),
            vmem_limit_bytes=vmem_limit),
        cost_estimate=pl.CostEstimate(
            flops=int(2 * N * H_out * W_out * W_in * C),
            transcendentals=0,
            bytes_accessed=int(in_bytes * reread + out_bytes)),
    )(jnp.asarray(sel, compute_dtype), x)


class UpSampleNearest2dNHWC:
    """JAX/Pallas equivalent of UpSampleNearest2d_NHWC (forward pass only)."""

    def __init__(self, output_size):
        self.output_size = tuple(int(s) for s in output_size)

    def __call__(self, x):
        return upsample_nearest2d_nhwc(x, self.output_size)


def _reference(x, output_size):
    """Pure-JAX reference with the same nearest rule."""
    N, H_in, W_in, C = x.shape
    H_out, W_out = output_size
    h_src = _nearest_src(H_out, H_in)
    w_src = _nearest_src(W_out, W_in)
    return x[:, h_src][:, :, w_src]


if __name__ == "__main__":
    key = jax.random.PRNGKey(0)
    k1, k2 = jax.random.split(key)

    # Small NHWC inputs consistent with the module (FPN-style nearest upsample).
    x1 = jax.random.normal(k1, (2, 16, 16, 4), dtype=jnp.float32)            # small C
    x2 = jax.random.normal(k2, (1, 8, 8, 128), dtype=jnp.float32).astype(jnp.bfloat16)

    def check(x, size, **kw):
        y = jax.block_until_ready(upsample_nearest2d_nhwc(x, size, **kw))
        y_ref = _reference(x, size)
        np.testing.assert_array_equal(np.asarray(y.astype(jnp.float32)),
                                      np.asarray(y_ref.astype(jnp.float32)))

    # 1) Module-style call: lane-folded path, integer 2x scale (the MaskRCNN/FPN case).
    y = jax.block_until_ready(UpSampleNearest2dNHWC((32, 32))(x1))
    np.testing.assert_array_equal(np.asarray(y), np.asarray(_reference(x1, (32, 32))))

    # 2) Lane-folded path, fractional scale in H and W.
    check(x1, (24, 40))

    # 3) Lane-dense (C=128) path, integer 2x scale, bf16.
    check(x2, (16, 16))

    # 4) Lane-dense path, fractional scale, bf16.
    check(x2, (12, 12))

    # 5) Per-output-row fallback kernel (exercised explicitly).
    check(x1, (20, 28), force_per_row=True)

    print("KERNEL_OK")
</pallas_src>

<mosaic_0001>
module attributes {stable_mosaic.version = 11 : i64} {
  func.func @kernel(%arg0: i32, %arg1: i32, %arg2: memref<64x128xf32, #tpu.memory_space<vmem>>, %arg3: memref<32x16xf32, #tpu.memory_space<vmem>>, %arg4: memref<1x16x64xf32, #tpu.memory_space<vmem>>, %arg5: memref<1x32x128xf32, #tpu.memory_space<vmem>>) attributes {dimension_semantics = [#tpu.dimension_semantics<parallel>, #tpu.dimension_semantics<parallel>], iteration_bounds = array<i64: 2, 1>, scalar_prefetch = 0 : i64, scratch_operands = 0 : i64, tpu.core_type = #tpu.core_type<tc>, window_params = [{pipeline_mode = #tpu.pipeline_mode<synchronous>, transform_indices = @transform_0, window_bounds = array<i64: 64, 128>}, {pipeline_mode = #tpu.pipeline_mode<synchronous>, transform_indices = @transform_1, window_bounds = array<i64: 32, 16>}, {transform_indices = @transform_2, window_bounds = array<i64: 1, 16, 64>}, {transform_indices = @transform_3, window_bounds = array<i64: 1, 32, 128>}]} {
    %c0 = arith.constant 0 : index
    %c0_0 = arith.constant 0 : index
    %c0_1 = arith.constant 0 : index
    %0 = vector.load %arg4[%c0, %c0_0, %c0_1] : memref<1x16x64xf32, #tpu.memory_space<vmem>>, vector<1x16x64xf32>
    %1 = vector.shape_cast %0 : vector<1x16x64xf32> to vector<16x64xf32>
    %c0_2 = arith.constant 0 : index
    %c0_3 = arith.constant 0 : index
    %2 = vector.load %arg2[%c0_2, %c0_3] : memref<64x128xf32, #tpu.memory_space<vmem>>, vector<64x128xf32>
    %cst = arith.constant dense<0.000000e+00> : vector<16x128xf32>
    %3 = tpu.matmul %1, %2, %cst {dimension_numbers = #tpu.dot_dimension_numbers<[1], [0], [0], [1], [0, 0, 1, 1], [], []>} : vector<16x64xf32>, vector<64x128xf32>, vector<16x128xf32> -> vector<16x128xf32>
    %c0_4 = arith.constant 0 : index
    %c0_5 = arith.constant 0 : index
    %4 = vector.load %arg3[%c0_4, %c0_5] : memref<32x16xf32, #tpu.memory_space<vmem>>, vector<32x16xf32>
    %cst_6 = arith.constant dense<0.000000e+00> : vector<32x128xf32>
    %5 = tpu.matmul %4, %3, %cst_6 {dimension_numbers = #tpu.dot_dimension_numbers<[1], [0], [0], [1], [0, 0, 1, 1], [], []>} : vector<32x16xf32>, vector<16x128xf32>, vector<32x128xf32> -> vector<32x128xf32>
    %c0_7 = arith.constant 0 : index
    %c0_8 = arith.constant 0 : index
    %c0_9 = arith.constant 0 : index
    %6 = vector.load %arg5[%c0_7, %c0_8, %c0_9] : memref<1x32x128xf32, #tpu.memory_space<vmem>>, vector<1x32x128xf32>
    %7 = vector.shape_cast %6 : vector<1x32x128xf32> to vector<32x128xf32>
    %8 = vector.shape_cast %5 : vector<32x128xf32> to vector<1x32x128xf32>
    tpu.vector_store %arg5[%c0_7, %c0_8, %c0_9], %8 {strides = array<i32>} : memref<1x32x128xf32, #tpu.memory_space<vmem>>, vector<1x32x128xf32>,
    return
  }
  func.func @transform_0(%arg0: i32, %arg1: i32) -> (i32, i32) {
    %c0_i32 = arith.constant 0 : i32
    %c0_i32_0 = arith.constant 0 : i32
    %c0_i32_1 = arith.constant 0 : i32
    return %c0_i32, %c0_i32_0 : i32, i32
  }
  func.func @transform_1(%arg0: i32, %arg1: i32) -> (i32, i32) {
    %c0_i32 = arith.constant 0 : i32
    %c0_i32_0 = arith.constant 0 : i32
    %c0_i32_1 = arith.constant 0 : i32
    return %c0_i32, %c0_i32_0 : i32, i32
  }
  func.func @transform_2(%arg0: i32, %arg1: i32) -> (i32, i32, i32) {
    %c0_i32 = arith.constant 0 : i32
    %c0_i32_0 = arith.constant 0 : i32
    return %arg0, %arg1, %c0_i32 : i32, i32, i32
  }
  func.func @transform_3(%arg0: i32, %arg1: i32) -> (i32, i32, i32) {
    %c0_i32 = arith.constant 0 : i32
    %c0_i32_0 = arith.constant 0 : i32
    return %arg0, %arg1, %c0_i32 : i32, i32, i32
  }
}

</mosaic_0001>

<bundles_post_ra>
// kernel: tpu_custom_call.1
= control target key start
LH: loop header
LB: loop body
LE: loop exit
PB: predicated region body
PF: predicated region fallthrough
CT: control target
= control target key end

     0   :  { %8 = vsyncpa [#allocation3], 0  ;;  %s941_s0 = inlined_call_operand.hbm [shape: f32[64,128], index: 0, kind: input, shape index: {}]   ;;  %s942_s1 = inlined_call_operand.vmem [shape: f32[32,16], index: 1, kind: input, shape index: {}]   ;;  %s943_s2 = inlined_call_operand.vmem [shape: f32[2,16,64], index: 2, kind: input, shape index: {}]   ;;  %s944_s3 = inlined_call_operand.hbm [shape: f32[2,32,128], index: 3, kind: output, shape index: {}]  }
   0x1   :  { %9 = vsyncpa [#allocation4], 0 }
   0x2   :  { %11 = vsyncpa [#allocation4 + $0x1], 0  ;;  %s792_s12 = smov 0   ;;  %s794_s13 = smov 0  }
   0x3   :  { %s796_s14 = smov 0   ;;  %s798_s15 = smov 0  }
   0x4   :  { %s800_s16 = smov 0   ;;  %s802_s17 = smov 0  }
   0x5 LB: > { %s520_s18 = sadd.s32 4294967295, %s764_s17   ;;  %s521_s19 = sadd.s32 4294967294, %s764_s17   ;;  %s764_s17 = sphi %s802_s17, %s17_s17   ;;  %s760_s16 = sphi %s800_s16, %s953_s16   ;;  %s756_s15 = sphi %s798_s15, %s952_s15   ;;  %s752_s14 = sphi %s796_s14, %s951_s14   ;;  %s748_s13 = sphi %s794_s13, %s950_s13   ;;  %s744_s12 = sphi %s792_s12, %s949_s12  }
   0x6   : > { %s29_s20 = sadd.s32 1, %s760_s16  ;;  %s108_s21 = sadd.s32 1, %s752_s14 }
   0x7   : > { %p31_p0 = scmp.ge.s32.totalorder %s29_s20, 2  ;;  %p118_p1 = scmp.ne.s32.totalorder %s752_s14, %s748_s13 }
   0x8   : > { %p119_p2 = scmp.eq.s32.totalorder %s520_s18, 1  ;;  %p124_p3 = scmp.ne.s32.totalorder %s748_s13, %s744_s12 }
   0x9   : > { %s955_s20 = smov (%p31_p0, %s29_s20), 0  ;;  %p125_p5 = scmp.eq.s32.totalorder %s521_s19, 1 }
   0xa   : > { %p832_p4 = por %p119_p2, %p118_p1  ;;  %s103_s23 = ssub.s32 %s760_s16, %s955_s20 }
   0xb   : > { %p522_p6 = scmp.ge.s32.totalorder %s764_s17, 1  ;;  %p106_p7 = scmp.eq.s32.totalorder %s103_s23, 0 }
   0xc   : > { %p839_p8 = por %p125_p5, %p124_p3  ;;  %p132_p9 = scmp.lt.s32.totalorder %s764_s17, 3 }
   0xd   : > { %s845_s25 = scalar_select %p106_p7, %s752_s14, %s108_s21  }
   0xe   : > { %p847_p10 = pnand %p522_p6, %p132_p9  ;;  %p851_p11 = scmp.eq.s32.totalorder %s520_s18, 0 }
   0xf   : > { %s766_s28 = smov [#allocation2]  }
  0x10   : > { %p594_p12 = pneg %p847_p10  ;;  %s144_s29 = sshll.u32 %s766_s28, 4  ;;  %s145_s29 = int_to_ptr.vmem [resolvable:$true] %s144_s29 }
  0x11   : > { %s669_s30 = scalar_lea.vmem %s145_s29, 1024  ;;  %p677_p5 = scmp.lt.s32.totalorder %s145_s29, %s145_s29 }
  0x12   : > { %p595_p13 = pnand %p851_p11, %p594_p12  ;;  %p670_p1 = scmp.ne.s32.totalorder %s145_s29, %s669_s30 }
  0x13   : > { %p678_p6 = scmp.lt.s32.totalorder %s669_s30, %s669_s30 }
  0x14   : > { %p660_p0 = pneg %p595_p13 }
  0x15   : > { %p679_p7 = por %p678_p6, %p677_p5 }
  0x16   : > { %p672_p2 = pnand %p670_p1, %p660_p0 }
  0x18   : > { %p673_p3 = pneg %p672_p2 }
  0x1a   : > { %p680_p9 = pnand %p679_p7, %p673_p3 }
  0x1c   : > { %683 = shalt.err (!%p680_p9)
}
  0x1d   : > { %s767_s4 = smov 128   ;;  %s768_s5 = smov 8  }
  0x1e   : > { %597 = dma.hbm_to_vmem [thread:$0]  (!%p595_p13), %s941_s0, 1024, %s145_s29, [#allocation3], %s767_s4, %s767_s4, %s768_s5  }
  0x1f   : > { %176 = sbr.rel (%p847_p10) target bundleno = 464 (0x1d0), region = 32 }
  0x24   : > { %735 = dma.done.wait (%p851_p11), [#allocation3], 1024  }
  0x25   : > { %737 = vsyncadd (%p851_p11), [#allocation3], 4294966272  ;;  %p205_p12 = scmp.lt.s32.totalorder %s756_s15, 1  ;;  %v224_v0 = vld [vmem:[#allocation2 + $0x38] sm:$0xff]  ;;  %v223_v1 = vld [vmem:[#allocation2 + $0x30] sm:$0xff]  ;;  %vm225_vm0 = vcmask 523264  }
  0x26   : > { %559 = vmatprep.subr.mxu0 %v224_v0  ;;  %v222_v2 = vld [vmem:[#allocation2 + $0x28] sm:$0xff]  ;;  %v221_v4 = vld [vmem:[#allocation2 + $0x20] sm:$0xff]  ;;  %v220_v5 = vld [vmem:[#allocation2 + $0x18] sm:$0xff]  ;;  %vm311_vm1 = vcmask 130048   ;;  %s201_s4 = sand.u32 1, %s748_s13  }
  0x27   : > { %s206_s8 = scalar_select %p205_p12, %s756_s15, 1  ;;  %560 = vmatpush3.msra.mxu0 %v224_v0  ;;  %v219_v6 = vld [vmem:[#allocation2 + $0x10] sm:$0xff]  ;;  %v218_v7 = vld [vmem:[#allocation2 + $0x8] sm:$0xff]  ;;  %v217_v8 = vld [vmem:[#allocation2] sm:$0xff] }
  0x28   : > { %561 = vmatprep.subr.mxu0 %v223_v1  ;;  %v307_v10 = vld [vmem:[%s942_s1] sm:$0xff]  ;;  %v308_v13 = vld [vmem:[%s942_s1 + $0x8] sm:$0xff]  ;;  %v309_v14 = vld [vmem:[%s942_s1 + $0x10] sm:$0xff]  ;;  %s527_s5 = sshll.u32 %s201_s4, 5 }
  0x29   : > { %s541_s9 = sshll.u32 %s206_s8, 4  ;;  %562 = vmatpush3.msra.mxu0 %v223_v1  ;;  %582 = vmatprep.mubr.msk.f32.mxu1 %vm311_vm1, %v307_v10  ;;  %v310_v15 = vld [vmem:[%s942_s1 + $0x18] sm:$0xff]  ;;  %s203_s6 = scalar_lea.vmem [#allocation5], %s527_s5 }
  0x2a   : > { %s212_s18 = scalar_lea.vmem %s943_s2, %s541_s9  ;;  %563 = vmatprep.subr.mxu0 %v222_v2  ;;  %s429_s7 = sshll.u32 %s203_s6, 4  ;;  %s889_s7 = int_to_ptr.vmem [resolvable:$true] %s429_s7 }
  0x2b   : > { %v215_v3 = vld [vmem:[%s212_s18] sm:$0xff]  ;;  %564 = vmatpush3.msra.mxu0 %v222_v2  ;;  %v216_v9 = vld [vmem:[%s212_s18 + $0x8] sm:$0xff]  ;;  %s542_s8 = sshll.u32 %s756_s15, 9  ;;  %s896_s18 = scalar_lea.sflag [#allocation4], %s201_s4 }
  0x2c   : > { %575 = vmatprep.mubr.msk.f32.mxu0 %vm225_vm0, %v215_v3  ;;  %565 = vmatprep.subr.mxu0 %v221_v4  ;;  %s894_s11 = scalar_lea.hbm %s944_s3, %s542_s8  ;;  %s684_s19 = scalar_lea.vmem %s889_s7, 512 }
  0x2d   : > { %566 = vmatpush3.msra.mxu0 %v221_v4  ;;  %p685_p10 = scmp.ne.s32.totalorder %s889_s7, %s684_s19  ;;  %s769_s15 = smov [#allocation5]  }
  0x2e   : > { %567 = vmatprep.subr.mxu0 %v220_v5  ;;  %s688_s21 = sshll.u32 %s769_s15, 4  ;;  %s689_s21 = int_to_ptr.vmem [resolvable:$false] %s688_s21 }
  0x2f   : > { %568 = vmatpush3.msra.mxu0 %v220_v5  ;;  %p686_p11 = pnand %p685_p10, %p832_p4  ;;  %s690_s23 = scalar_lea.vmem %s689_s21, 1024 }
  0x30   : > { %569 = vmatprep.subr.mxu0 %v219_v6  ;;  %p691_p0 = scmp.lt.s32.totalorder %s889_s7, %s689_s21  ;;  %p692_p1 = scmp.lt.s32.totalorder %s690_s23, %s684_s19 }
  0x31   : > { %570 = vmatpush3.msra.mxu0 %v219_v6  ;;  %p687_p13 = pneg %p686_p11 }
  0x32   : > { %571 = vmatprep.subr.mxu0 %v218_v7  ;;  %p693_p2 = por %p692_p1, %p691_p0 }
  0x33   : > { %572 = vmatpush3.msra.mxu0 %v218_v7 }
  0x34   : > { %573 = vmatprep.subr.mxu0 %v217_v8  ;;  %p694_p3 = pnand %p693_p2, %p687_p13 }
  0x35   : > { %574 = vmatpush3.msra.mxu0 %v217_v8 }
  0x36   : > { %576 = vmatmul.mubr.msk.f32.vlgmr.msra.gmra.mxu0 %vm225_vm0, %v216_v9 }
  0xf6   : > { %v577_v11 = vpop.f32.mrf.mxu0 }
  0xf7   : > { %578 = vmatprep.subr.mxu1 %v577_v11 }
  0xf8   : > { %v298_v12 = vpop.f32.mrf.mxu0  ;;  %579 = vmatpush3.msra.mxu1 %v577_v11 }
  0xf9   : > { %580 = vmatprep.subr.mxu1 %v298_v12 }
  0xfa   : > { %581 = vmatpush3.msra.mxu1 %v298_v12 }
  0xfb   : > { %583 = vmatmul.mubr.msk.f32.vlgmr.msra.gmra.mxu1 %vm311_vm1, %v308_v13 }
  0xfc   : > { %585 = vmatprep.mubr.msk.f32.mxu1 %vm311_vm1, %v309_v14 }
  0xff   : > { %586 = vmatmul.mubr.msk.f32.gmra.mxu1 %vm311_vm1, %v310_v15 }
 0x1bb   : > { %v584_v16 = vpop.f32.mrf.mxu1 }
 0x1bc   : > { %410 = vst [vmem:[%s203_s6 + $0x8] sm:$0xff] %v584_v16 }
 0x1bd   : > { %v390_v17 = vpop.f32.mrf.mxu1 }
 0x1be   : > { %409 = vst [vmem:[%s203_s6] sm:$0xff] %v390_v17 }
 0x1bf   : > { %v587_v18 = vpop.f32.mrf.mxu1 }
 0x1c0   : > { %412 = vst [vmem:[%s203_s6 + $0x18] sm:$0xff] %v587_v18 }
 0x1c1   : > { %v400_v19 = vpop.f32.mrf.mxu1 }
 0x1c2   : > { %411 = vst [vmem:[%s203_s6 + $0x10] sm:$0xff] %v400_v19 }
 0x1c3   : > { %697 = shalt.err (!%p694_p3)
}
 0x1c4   : > { %s698_s26 = scalar_lea.hbm %s894_s11, 512  ;;  %s702_s29 = scalar_lea.hbm %s944_s3, 1024 }
 0x1c5   : > { %p699_p5 = scmp.ne.s32.totalorder %s894_s11, %s698_s26  ;;  %p703_p9 = scmp.lt.s32.totalorder %s894_s11, %s944_s3 }
 0x1c6   : > { %p704_p12 = scmp.lt.s32.totalorder %s702_s29, %s698_s26 }
 0x1c7   : > { %p700_p6 = pnand %p699_p5, %p832_p4 }
 0x1c8   : > { %p705_p10 = por %p704_p12, %p703_p9 }
 0x1c9   : > { %p701_p7 = pneg %p700_p6 }
 0x1cb   : > { %p706_p11 = pnand %p705_p10, %p701_p7 }
 0x1cd   : > { %709 = shalt.err (!%p706_p11)
}
 0x1ce   : > { %s770_s5 = smov 128   ;;  %s771_s6 = smov 8  }
 0x1cf   : > { %592 = dma.vmem_to_hbm [thread:$0]  (%p832_p4), %s889_s7, 512, %s894_s11, %s896_s18, %s770_s5, %s770_s5, %s771_s6  }
 0x1d0 PF: > { %p604_p13 = scmp.ge.s32.totalorder %s764_s17, 2  ;;  %s444_s8 = sand.u32 1, %s744_s12  }
 0x1d1   : > { %s445_s9 = scalar_lea.sflag [#allocation4], %s444_s8 }
 0x1d2   : > { %p599_p0 = pnand %p604_p13, %p839_p8 }
 0x1d4   : > { %p600_p1 = pneg %p599_p0 }
 0x1d6   : > { %739 = dma.done.wait (%p600_p1), %s445_s9, 512  }
 0x1d7   : > { %741 = vsyncadd (%p600_p1), %s445_s9, 4294966784  ;;  %s17_s17 = sadd.s32 1, %s764_s17   ;;  %s949_s12 = smov %s748_s13 }
 0x1d8   : > { %p14_p2 = scmp.ge.s32.totalorder %s17_s17, 4   ;;  %s950_s13 = smov %s752_s14 }
 0x1d9   : > { %s951_s14 = smov %s845_s25  ;;  %s952_s15 = smov %s760_s16 }
 0x1da   : > { %s953_s16 = smov %s955_s20  ;;  %16 = sbr.rel (!%p14_p2) target bundleno = 5 (0x5), region = 72 }
 0x1df   :  { %450 = vsyncpa [#allocation3], 1 }
 0x1e0   :  { %452 = vsyncpa [#allocation3 + $0x1], 1 }
 0x1e1   :  { %453 = vsyncpa [#allocation4], 1 }
 0x1e2   :  { %455 = vsyncpa [#allocation4 + $0x1], 1 }

</bundles_post_ra>
